<compile_context>
chip_gen: v7x
topology: tpu7x:2x2x1
jax: 0.10.0
libtpu: 0.0.40
codegen_flags: <defaults>
</compile_context>

<pallas_src>
import jax
import jax.numpy as jnp
from jax.experimental import pallas as pl
from jax.experimental.pallas import tpu as pltpu

_LANE = 128                      # vreg lane width
_SUBLANE = 8                     # vreg sublane count (32-bit)
_TILE_ELEMS = _LANE * _SUBLANE   # 1024 elements per (8, 128) tile


def _copy_kernel(x_ref, o_ref):
    # TODO(synk): Model.forward is abstract (raises NotImplementedError) and
    # has no parameters; the only faithful forward is a pass-through.  This
    # kernel exists purely as the tiled, lane-dense template a concrete
    # subclass would replace with real compute.
    o_ref[...] = x_ref[...]


def _pick_block_rows(rows, itemsize):
    """~4 MiB tiles: pipelined footprint is 2 (double-buffer) x 2 (in+out)
    x tile ~= 16 MiB, which fits every TPU generation once vmem_limit_bytes
    is set explicitly (v5e's *default* scoped VMEM is only 16 MiB)."""
    target_tile_bytes = 4 << 20
    block_rows = (target_tile_bytes // (_LANE * itemsize)) // _SUBLANE * _SUBLANE
    block_rows = max(_SUBLANE, block_rows)
    return min(rows, block_rows)


def _lane_dense_copy(x2d):
    """Tiled lane-dense pass-through over a (rows, 128) slab."""
    rows, lanes = x2d.shape
    block_rows = _pick_block_rows(rows, x2d.dtype.itemsize)
    tile_bytes = block_rows * lanes * x2d.dtype.itemsize
    # in + out, double-buffered, plus headroom; explicit so the same block
    # size compiles on v5e as well.  NOTE: the copy still streams 2N bytes
    # HBM<->VMEM regardless of any aliasing; the only way to cut traffic for
    # an identity is to not launch the kernel (see model_forward).
    vmem_limit = int(min(4 * tile_bytes + (4 << 20), 32 << 20))
    grid = (pl.cdiv(rows, block_rows),)  # ragged last block handled by Pallas
    return pl.pallas_call(
        _copy_kernel,
        out_shape=jax.ShapeDtypeStruct(x2d.shape, x2d.dtype),
        grid=grid,
        in_specs=[pl.BlockSpec((block_rows, lanes), lambda i: (i, 0))],
        out_specs=pl.BlockSpec((block_rows, lanes), lambda i: (i, 0)),
        compiler_params=pltpu.CompilerParams(
            dimension_semantics=("parallel",),
            vmem_limit_bytes=vmem_limit,
        ),
    )(x2d)


def model_forward(x):
    """Pallas/JAX equivalent of Model.forward(x) -> tuple(Tensor,).

    The reference forward is abstract (no parameters, no compute), so the
    faithful — and optimal — pass-through touches no data at all: no kernel
    launch, no padding, no HBM round trips.
    """
    return (x,)


@jax.jit
def model_forward_pallas(x):
    """Same semantics, routed through the tiled Pallas template kernel.

    Exercised in __main__ as the hot-path skeleton a concrete subclass would
    reuse.  The wrapper avoids all padding / slicing whenever the element
    count is already a whole number of (8, 128) vreg tiles.
    """
    orig_shape = x.shape
    n = 1
    for d in orig_shape:
        n *= int(d)

    if n % _TILE_ELEMS == 0:
        # Aligned fast path: reshapes are free bitcasts; no pad, no slice.
        out2d = _lane_dense_copy(x.reshape(n // _LANE, _LANE))
        out = out2d.reshape(orig_shape)
    else:
        # Fallback: pad only up to tile granularity (the grid masks the
        # ragged last block).  The trailing [:n] slice is a real copy, which
        # is why the aligned path above avoids this branch entirely.
        rows = pl.cdiv(n, _TILE_ELEMS) * _SUBLANE
        flat = x.reshape(-1)
        flat_p = jnp.pad(flat, (0, rows * _LANE - n))
        out2d = _lane_dense_copy(flat_p.reshape(rows, _LANE))
        out = out2d.reshape(-1)[:n].reshape(orig_shape)
    return (out,)


if __name__ == "__main__":
    key = jax.random.PRNGKey(0)
    # 2 * 4 * 16 * 16 = 2048 elements -> exactly two (8,128) tiles (aligned path).
    x = jax.random.normal(key, (2, 4, 16, 16), dtype=jnp.float32)

    # Faithful forward (identity pass-through): zero cost, no kernel.
    (out_fast,) = model_forward(x)

    # Kernel-template path, exercised once for validation.
    (out_kernel,) = model_forward_pallas(x)
    jax.block_until_ready(out_kernel)

    assert out_kernel.shape == x.shape and out_kernel.dtype == x.dtype
    assert bool(jnp.allclose(out_kernel, x))
    assert bool(jnp.allclose(out_fast, x))

    # Also hit the padded fallback once (2*2*14*14 = 784, not tile aligned).
    y = jax.random.normal(jax.random.PRNGKey(1), (2, 2, 14, 14), dtype=jnp.float32)
    (out_pad,) = model_forward_pallas(y)
    jax.block_until_ready(out_pad)
    assert bool(jnp.allclose(out_pad, y))

    print("KERNEL_OK")
</pallas_src>

<mosaic_0001>
module attributes {stable_mosaic.version = 11 : i64} {
  func.func @_copy_kernel(%arg0: i32, %arg1: memref<16x128xf32, #tpu.memory_space<vmem>>, %arg2: memref<16x128xf32, #tpu.memory_space<vmem>>) attributes {dimension_semantics = [#tpu.dimension_semantics<parallel>], iteration_bounds = array<i64: 1>, scalar_prefetch = 0 : i64, scratch_operands = 0 : i64, tpu.core_type = #tpu.core_type<tc>, window_params = [{transform_indices = @transform_0, window_bounds = array<i64: 16, 128>}, {transform_indices = @transform_1, window_bounds = array<i64: 16, 128>}]} {
    %c0 = arith.constant 0 : index
    %c0_0 = arith.constant 0 : index
    %0 = vector.load %arg1[%c0, %c0_0] : memref<16x128xf32, #tpu.memory_space<vmem>>, vector<16x128xf32>
    %c0_1 = arith.constant 0 : index
    %c0_2 = arith.constant 0 : index
    %1 = vector.load %arg2[%c0_1, %c0_2] : memref<16x128xf32, #tpu.memory_space<vmem>>, vector<16x128xf32>
    tpu.vector_store %arg2[%c0_1, %c0_2], %0 {strides = array<i32>} : memref<16x128xf32, #tpu.memory_space<vmem>>, vector<16x128xf32>,
    return
  }
  func.func @transform_0(%arg0: i32) -> (i32, i32) {
    %c0_i32 = arith.constant 0 : i32
    %c0_i32_0 = arith.constant 0 : i32
    return %arg0, %c0_i32 : i32, i32
  }
  func.func @transform_1(%arg0: i32) -> (i32, i32) {
    %c0_i32 = arith.constant 0 : i32
    %c0_i32_0 = arith.constant 0 : i32
    return %arg0, %c0_i32 : i32, i32
  }
}

</mosaic_0001>

<bundles_post_ra>
// kernel: model_forward_pallas.1
= control target key start
LH: loop header
LB: loop body
LE: loop exit
PB: predicated region body
PF: predicated region fallthrough
CT: control target
= control target key end

     0   :  { %s38_s0 = inlined_call_operand.vmem [shape: f32[16,128], index: 0, kind: input, shape index: {}]   ;;  %s39_s1 = inlined_call_operand.vmem [shape: f32[16,128], index: 1, kind: output, shape index: {}]  }
   0x1   :  { %v8_v0 = vld [vmem:[%s38_s0] sm:$0xff]  ;;  %v9_v1 = vld [vmem:[%s38_s0 + $0x8] sm:$0xff] }
   0x2   :  { %10 = vst [vmem:[%s39_s1] sm:$0xff] %v8_v0  ;;  %11 = vst [vmem:[%s39_s1 + $0x8] sm:$0xff] %v9_v1 }

</bundles_post_ra>
